<compile_context>
chip_gen: v6e
topology: v6e:2x2x1
jax: 0.10.0
libtpu: 0.0.40
codegen_flags: <defaults>
</compile_context>

<pallas_src>
import jax
import jax.numpy as jnp
from jax.experimental import pallas as pl
from jax.experimental.pallas import tpu as pltpu


def _se_kernel(x_ref, w1t_ref, b1_ref, w2t_ref, b2_ref, o_ref):
    # x_ref block: (TN, C, HW) in the input dtype.
    # Resident weights: w1t (C, Cr) with 1/HW folded in, b1 (1, Cr),
    #                   w2t (Cr, C), b2 (1, C).
    xb = x_ref[...]                                                # (TN, C, HW)

    # Global average pool over the spatial (lane) axis; accumulate in f32
    # without materializing an f32 copy of the slab (1/HW lives in w1t).
    pooled_sum = jnp.sum(xb, axis=-1, dtype=jnp.float32)          # (TN, C)

    # FC1 -> ReLU -> FC2 -> Sigmoid, batch on the matmul output (M) dim.
    h = jnp.dot(pooled_sum, w1t_ref[...],
                preferred_element_type=jnp.float32) + b1_ref[...]  # (TN, Cr)
    h = jnp.maximum(h, 0.0)
    s = jnp.dot(h, w2t_ref[...],
                preferred_element_type=jnp.float32) + b2_ref[...]  # (TN, C)
    s = jax.nn.sigmoid(s)                                          # (TN, C) f32

    # Cast only the tiny scale; the wide multiply + store stay in input dtype.
    o_ref[...] = xb * s.astype(xb.dtype)[:, :, None]


def _round_up(x, m):
    return ((x + m - 1) // m) * m


def _divisors(n):
    out = set()
    i = 1
    while i * i <= n:
        if n % i == 0:
            out.add(i)
            out.add(n // i)
        i += 1
    return sorted(out)


def _choose_tn(n, real_img_bytes, padded_img_bytes, vmem_budget):
    """Pick the batch-tile size TN as a divisor of N (no padding / tail slice):
    large enough to amortize the ~0.35 us per-step overhead (~8 MiB blocks),
    small enough that double-buffered in+out blocks fit the VMEM budget, and
    preferring an even number of grid steps for v7x's two TensorCores."""
    usable = max(4 * padded_img_bytes, vmem_budget - 8 * 1024 * 1024)
    max_tn_vmem = max(1, usable // (4 * padded_img_bytes))
    target_tn = max(1, (8 * 1024 * 1024) // real_img_bytes)
    cap = max(1, min(max_tn_vmem, target_tn, n))

    divs = _divisors(n)
    tn = max(d for d in divs if d <= cap)            # d == 1 always fits

    n_blocks = n // tn
    if n >= 2 and n_blocks % 2 == 1 and n_blocks < 8:
        even = [d for d in divs if d <= cap and (n // d) % 2 == 0]
        if even:
            tn = max(even)
    return int(tn)


def seq_ex_block(x, w1, b1, w2, b2):
    """x: (N, C, H, W). w1: (Cr, C), b1: (Cr,), w2: (C, Cr), b2: (C,)."""
    N, C, H, W = x.shape
    Cr = w1.shape[0]
    HW = H * W
    itemsize = jnp.dtype(x.dtype).itemsize

    real_img_bytes = C * HW * itemsize
    padded_img_bytes = _round_up(C, 8) * _round_up(HW, 128) * itemsize

    # Per-generation VMEM budget: ~3/4 of physical capacity
    # (v7x 64 MiB -> 48 MiB; v5e/v6e 128 MiB -> 96 MiB).
    try:
        vmem_cap = int(pltpu.get_tpu_info().vmem_capacity_bytes)
    except Exception:
        vmem_cap = 64 * 1024 * 1024
    vmem_budget = (3 * vmem_cap) // 4

    TN = _choose_tn(N, real_img_bytes, padded_img_bytes, vmem_budget)
    n_blocks = N // TN                                 # TN divides N exactly

    x_flat = x.reshape(N, C, HW)

    # Pre-transpose weights so the batch lands on the matmul output dim and
    # fold the 1/HW pooling scale into W1^T (math: (sum/HW)@W1^T = sum@(W1^T/HW)).
    w1t = (w1.astype(jnp.float32).T / float(HW)).astype(w1.dtype)   # (C, Cr)
    w2t = w2.T                                                      # (Cr, C)
    b1_row = b1.reshape(1, Cr).astype(jnp.float32)
    b2_row = b2.reshape(1, C).astype(jnp.float32)

    needed = 4 * TN * padded_img_bytes + 8 * 1024 * 1024
    vmem_limit = int(min(vmem_cap, max(vmem_budget, needed)))

    out_flat = pl.pallas_call(
        _se_kernel,
        out_shape=jax.ShapeDtypeStruct((N, C, HW), x.dtype),
        grid_spec=pltpu.PrefetchScalarGridSpec(
            num_scalar_prefetch=0,
            grid=(n_blocks,),
            in_specs=[
                pl.BlockSpec((TN, C, HW), lambda n: (n, 0, 0)),  # x slab
                pl.BlockSpec((C, Cr), lambda n: (0, 0)),         # W1^T/HW (resident)
                pl.BlockSpec((1, Cr), lambda n: (0, 0)),         # b1
                pl.BlockSpec((Cr, C), lambda n: (0, 0)),         # W2^T
                pl.BlockSpec((1, C), lambda n: (0, 0)),          # b2
            ],
            out_specs=pl.BlockSpec((TN, C, HW), lambda n: (n, 0, 0)),
        ),
        compiler_params=pltpu.CompilerParams(
            dimension_semantics=("parallel",),
            vmem_limit_bytes=vmem_limit),
    )(x_flat, w1t, b1_row, w2t, b2_row)

    return out_flat.reshape(N, C, H, W)


def seq_ex_block_ref(x, w1, b1, w2, b2):
    """Plain-JAX reference mirroring the PyTorch forward."""
    pooled = x.reshape(*x.shape[:-2], -1).mean(-1)          # (N, C)
    h = jax.nn.relu(pooled @ w1.T + b1)                     # (N, Cr)
    s = jax.nn.sigmoid(h @ w2.T + b2)                       # (N, C)
    return x * s[:, :, None, None]


if __name__ == "__main__":
    # Small shapes consistent with the module: in_ch=4, r=2, N=2, H=W=16
    N, C, H, W = 2, 4, 16, 16
    r = 2
    Cr = C // r

    key = jax.random.PRNGKey(0)
    kx, k1, k2, k3, k4 = jax.random.split(key, 5)

    x = jax.random.normal(kx, (N, C, H, W), dtype=jnp.float32)
    # nn.Linear(in_ch, in_ch // r): weight (Cr, C), bias (Cr,)
    w1 = jax.random.normal(k1, (Cr, C), dtype=jnp.float32) * 0.1
    b1 = jax.random.normal(k2, (Cr,), dtype=jnp.float32) * 0.1
    # nn.Linear(in_ch // r, in_ch): weight (C, Cr), bias (C,)
    w2 = jax.random.normal(k3, (C, Cr), dtype=jnp.float32) * 0.1
    b2 = jax.random.normal(k4, (C,), dtype=jnp.float32) * 0.1

    out = seq_ex_block(x, w1, b1, w2, b2)
    out = jax.block_until_ready(out)

    ref = seq_ex_block_ref(x, w1, b1, w2, b2)
    assert out.shape == (N, C, H, W)
    assert jnp.allclose(out, ref, atol=1e-5, rtol=1e-5), "mismatch vs reference"

    print("KERNEL_OK")
</pallas_src>

<mosaic_0001>
module attributes {stable_mosaic.version = 11 : i64} {
  func.func @_se_kernel(%arg0: i32, %arg1: memref<1x4x256xf32, #tpu.memory_space<vmem>>, %arg2: memref<4x2xf32, #tpu.memory_space<vmem>>, %arg3: memref<1x2xf32, #tpu.memory_space<vmem>>, %arg4: memref<2x4xf32, #tpu.memory_space<vmem>>, %arg5: memref<1x4xf32, #tpu.memory_space<vmem>>, %arg6: memref<1x4x256xf32, #tpu.memory_space<vmem>>) attributes {dimension_semantics = [#tpu.dimension_semantics<parallel>], iteration_bounds = array<i64: 2>, scalar_prefetch = 0 : i64, scratch_operands = 0 : i64, tpu.core_type = #tpu.core_type<tc>, window_params = [{transform_indices = @transform_0, window_bounds = array<i64: 1, 4, 256>}, {pipeline_mode = #tpu.pipeline_mode<synchronous>, transform_indices = @transform_1, window_bounds = array<i64: 4, 2>}, {pipeline_mode = #tpu.pipeline_mode<synchronous>, transform_indices = @transform_2, window_bounds = array<i64: 1, 2>}, {pipeline_mode = #tpu.pipeline_mode<synchronous>, transform_indices = @transform_3, window_bounds = array<i64: 2, 4>}, {pipeline_mode = #tpu.pipeline_mode<synchronous>, transform_indices = @transform_4, window_bounds = array<i64: 1, 4>}, {transform_indices = @transform_5, window_bounds = array<i64: 1, 4, 256>}]} {
    %c0 = arith.constant 0 : index
    %c0_0 = arith.constant 0 : index
    %c0_1 = arith.constant 0 : index
    %0 = vector.load %arg1[%c0, %c0_0, %c0_1] : memref<1x4x256xf32, #tpu.memory_space<vmem>>, vector<1x4x256xf32>
    %cst = arith.constant dense<0.000000e+00> : vector<1x4xf32>
    %1 = vector.multi_reduction <add>, %0, %cst [2] : vector<1x4x256xf32> to vector<1x4xf32>
    %c0_2 = arith.constant 0 : index
    %c0_3 = arith.constant 0 : index
    %2 = vector.load %arg2[%c0_2, %c0_3] : memref<4x2xf32, #tpu.memory_space<vmem>>, vector<4x2xf32>
    %cst_4 = arith.constant dense<0.000000e+00> : vector<1x2xf32>
    %3 = tpu.matmul %1, %2, %cst_4 {dimension_numbers = #tpu.dot_dimension_numbers<[1], [0], [0], [1], [0, 0, 1, 1], [], []>} : vector<1x4xf32>, vector<4x2xf32>, vector<1x2xf32> -> vector<1x2xf32>
    %c0_5 = arith.constant 0 : index
    %c0_6 = arith.constant 0 : index
    %4 = vector.load %arg3[%c0_5, %c0_6] : memref<1x2xf32, #tpu.memory_space<vmem>>, vector<1x2xf32>
    %5 = arith.addf %3, %4 : vector<1x2xf32>
    %cst_7 = arith.constant 0.000000e+00 : f32
    %6 = vector.broadcast %cst_7 : f32 to vector<1x2xf32>
    %7 = arith.maximumf %5, %6 : vector<1x2xf32>
    %c0_8 = arith.constant 0 : index
    %c0_9 = arith.constant 0 : index
    %8 = vector.load %arg4[%c0_8, %c0_9] : memref<2x4xf32, #tpu.memory_space<vmem>>, vector<2x4xf32>
    %cst_10 = arith.constant dense<0.000000e+00> : vector<1x4xf32>
    %9 = tpu.matmul %7, %8, %cst_10 {dimension_numbers = #tpu.dot_dimension_numbers<[1], [0], [0], [1], [0, 0, 1, 1], [], []>} : vector<1x2xf32>, vector<2x4xf32>, vector<1x4xf32> -> vector<1x4xf32>
    %c0_11 = arith.constant 0 : index
    %c0_12 = arith.constant 0 : index
    %10 = vector.load %arg5[%c0_11, %c0_12] : memref<1x4xf32, #tpu.memory_space<vmem>>, vector<1x4xf32>
    %11 = arith.addf %9, %10 : vector<1x4xf32>
    %12 = arith.negf %11 : vector<1x4xf32>
    %13 = math.exp %12 : vector<1x4xf32>
    %cst_13 = arith.constant 1.000000e+00 : f32
    %14 = vector.broadcast %cst_13 : f32 to vector<1x4xf32>
    %15 = arith.addf %14, %13 : vector<1x4xf32>
    %16 = arith.divf %14, %15 : vector<1x4xf32>
    %17 = vector.shape_cast %16 : vector<1x4xf32> to vector<1x4x1xf32>
    %18 = vector.broadcast %17 : vector<1x4x1xf32> to vector<1x4x256xf32>
    %19 = arith.mulf %0, %18 : vector<1x4x256xf32>
    %c0_14 = arith.constant 0 : index
    %c0_15 = arith.constant 0 : index
    %c0_16 = arith.constant 0 : index
    %20 = vector.load %arg6[%c0_14, %c0_15, %c0_16] : memref<1x4x256xf32, #tpu.memory_space<vmem>>, vector<1x4x256xf32>
    tpu.vector_store %arg6[%c0_14, %c0_15, %c0_16], %19 {strides = array<i32>} : memref<1x4x256xf32, #tpu.memory_space<vmem>>, vector<1x4x256xf32>,
    return
  }
  func.func @transform_0(%arg0: i32) -> (i32, i32, i32) {
    %c0_i32 = arith.constant 0 : i32
    %c0_i32_0 = arith.constant 0 : i32
    %c0_i32_1 = arith.constant 0 : i32
    return %arg0, %c0_i32, %c0_i32_0 : i32, i32, i32
  }
  func.func @transform_1(%arg0: i32) -> (i32, i32) {
    %c0_i32 = arith.constant 0 : i32
    %c0_i32_0 = arith.constant 0 : i32
    %c0_i32_1 = arith.constant 0 : i32
    return %c0_i32, %c0_i32_0 : i32, i32
  }
  func.func @transform_2(%arg0: i32) -> (i32, i32) {
    %c0_i32 = arith.constant 0 : i32
    %c0_i32_0 = arith.constant 0 : i32
    %c0_i32_1 = arith.constant 0 : i32
    return %c0_i32, %c0_i32_0 : i32, i32
  }
  func.func @transform_3(%arg0: i32) -> (i32, i32) {
    %c0_i32 = arith.constant 0 : i32
    %c0_i32_0 = arith.constant 0 : i32
    %c0_i32_1 = arith.constant 0 : i32
    return %c0_i32, %c0_i32_0 : i32, i32
  }
  func.func @transform_4(%arg0: i32) -> (i32, i32) {
    %c0_i32 = arith.constant 0 : i32
    %c0_i32_0 = arith.constant 0 : i32
    %c0_i32_1 = arith.constant 0 : i32
    return %c0_i32, %c0_i32_0 : i32, i32
  }
  func.func @transform_5(%arg0: i32) -> (i32, i32, i32) {
    %c0_i32 = arith.constant 0 : i32
    %c0_i32_0 = arith.constant 0 : i32
    %c0_i32_1 = arith.constant 0 : i32
    return %arg0, %c0_i32, %c0_i32_0 : i32, i32, i32
  }
}

</mosaic_0001>

<bundles_post_ra>
// kernel: tpu_custom_call.1
= control target key start
LH: loop header
LB: loop body
LE: loop exit
PB: predicated region body
PF: predicated region fallthrough
CT: control target
= control target key end

     0   :  { %10 = vsyncpa [#allocation3], 0  ;;  %s901_s0 = inlined_call_operand.hbm [shape: f32[2,4,256], index: 0, kind: input, shape index: {}]   ;;  %s902_s1 = inlined_call_operand.vmem [shape: f32[4,2], index: 1, kind: input, shape index: {}]   ;;  %s903_s2 = inlined_call_operand.vmem [shape: f32[1,2], index: 2, kind: input, shape index: {}]   ;;  %s904_s3 = inlined_call_operand.vmem [shape: f32[2,4], index: 3, kind: input, shape index: {}]   ;;  %s905_s4 = inlined_call_operand.vmem [shape: f32[1,4], index: 4, kind: input, shape index: {}]   ;;  %s906_s5 = inlined_call_operand.hbm [shape: f32[2,4,256], index: 5, kind: output, shape index: {}]  }
   0x1   :  { %12 = vsyncpa [#allocation3 + $0x1], 0 }
   0x2   :  { %13 = vsyncpa [#allocation4], 0 }
   0x3   :  { %15 = vsyncpa [#allocation4 + $0x1], 0  ;;  %s744_s18 = smov 0   ;;  %s746_s19 = smov 0  }
   0x4   :  { %s748_s20 = smov 0   ;;  %s750_s21 = smov 0  }
   0x5 LB: > { %s765_s22 = sadd.s32 4294967295, %s707_s21   ;;  %s526_s23 = sadd.s32 4294967294, %s707_s21   ;;  %s707_s21 = sphi %s750_s21, %s923_s21   ;;  %s703_s20 = sphi %s748_s20, %s922_s20   ;;  %s699_s19 = sphi %s746_s19, %s921_s19   ;;  %s695_s18 = sphi %s744_s18, %s920_s18  }
   0x6   : > { %s769_s24 = sadd.s32 1, %s707_s21   ;;  %s28_s25 = sadd.s32 1, %s703_s20 }
   0x7   : > { %s25_s26 = ssub.s32 %s707_s21, %s769_s24  ;;  %p35_p0 = scmp.ne.s32.totalorder %s703_s20, %s699_s19 }
   0x8   : > { %p26_p1 = scmp.eq.s32.totalorder %s25_s26, 0  ;;  %p36_p2 = scmp.eq.s32.totalorder %s707_s21, 0 }
   0x9   : > { %p41_p3 = scmp.ne.s32.totalorder %s699_s19, %s695_s18  ;;  %p42_p4 = scmp.eq.s32.totalorder %s765_s22, 0 }
   0xa   : > { %s781_s27 = scalar_select %p26_p1, %s703_s20, %s28_s25  }
   0xb   : > { %p783_p5 = por %p36_p2, %p35_p0  ;;  %p787_p6 = por %p42_p4, %p41_p3 }
   0xc   : > { %p149_p7 = scmp.eq.s32.totalorder %s765_s22, 1  ;;  %p155_p8 = scmp.eq.s32.totalorder %s526_s23, 1 }
   0xd   : > { %s910_s29 = scalar_select %p787_p6, 1, 0 }
   0xe   : > { %p573_p10 = scmp.lt.s32.totalorder %s707_s21, 2  ;;  %p794_p11 = por %p149_p7, %p35_p0 }
   0xf   : > { %p798_p12 = por %p155_p8, %p41_p3  ;;  %s187_s7 = sand.u32 1, %s703_s20  }
  0x10   : > { %s911_s30 = scalar_select %p794_p11, 1, 0 }
  0x11   : > { %s912_s6 = scalar_select %p798_p12, 1, 0 }
  0x12   : > { %s545_s8 = sshll.u32 %s707_s21, 7  ;;  %s529_s9 = sshll.u32 %s187_s7, 3 }
  0x13   : > { %s807_s12 = scalar_lea.hbm %s901_s0, %s545_s8  ;;  %s191_s13 = scalar_lea.vmem [#allocation2], %s529_s9 }
  0x14   : > { %s199_s14 = sshll.u32 %s191_s13, 4  ;;  %p811_p13 = pnand %p573_p10, %p783_p5  ;;  %s815_s14 = int_to_ptr.vmem [resolvable:$true] %s199_s14 }
  0x15   : > { %s188_s16 = scalar_lea.sflag [#allocation3], %s187_s7  ;;  %s615_s17 = scalar_lea.hbm %s807_s12, 128 }
  0x16   : > { %p616_p2 = scmp.ne.s32.totalorder %s807_s12, %s615_s17  ;;  %p617_p3 = pneg %p811_p13 }
  0x17   : > { %s620_s26 = scalar_lea.hbm %s901_s0, 256  ;;  %p621_p5 = scmp.lt.s32.totalorder %s807_s12, %s901_s0 }
  0x18   : > { %p618_p4 = pnand %p617_p3, %p616_p2  ;;  %p622_p8 = scmp.lt.s32.totalorder %s620_s26, %s615_s17 }
  0x1a   : > { %p619_p7 = pneg %p618_p4  ;;  %p623_p10 = por %p622_p8, %p621_p5 }
  0x1c   : > { %p624_p9 = pnand %p623_p10, %p619_p7 }
  0x1e   : > { %627 = shalt.err (!%p624_p9)
}
  0x1f   : > { %s628_s7 = scalar_lea.vmem %s815_s14, 128  ;;  %s709_s9 = smov [#allocation2]  }
  0x20   : > { %p629_p0 = scmp.ne.s32.totalorder %s815_s14, %s628_s7  ;;  %s633_s10 = sshll.u32 %s709_s9, 4  ;;  %s634_s10 = int_to_ptr.vmem [resolvable:$false] %s633_s10 }
  0x21   : > { %s635_s11 = scalar_lea.vmem %s634_s10, 256  ;;  %p636_p4 = scmp.lt.s32.totalorder %s815_s14, %s634_s10 }
  0x22   : > { %p631_p1 = pnand %p629_p0, %p617_p3  ;;  %p637_p12 = scmp.lt.s32.totalorder %s635_s11, %s628_s7 }
  0x24   : > { %p632_p2 = pneg %p631_p1  ;;  %p638_p11 = por %p637_p12, %p636_p4 }
  0x26   : > { %p639_p6 = pnand %p638_p11, %p632_p2 }
  0x28   : > { %642 = shalt.err (!%p639_p6)
}
  0x29   : > { %568 = dma.hbm_to_vmem [thread:$0]  (!%p811_p13), %s807_s12, 128, %s815_s14, %s188_s16  }
  0x2a   : > { %p914_p9 = scmp.lt.s32.totalorder %s707_s21, 3  ;;  %p915_p7 = scmp.ge.s32.totalorder %s707_s21, 1 }
  0x2c   : > { %p205_p0 = pnand %p915_p7, %p914_p9 }
  0x2d   : > { %s842_s13 = sand.u32 (!%p205_p0), 1, %s699_s19   ;;  %p916_p6 = scmp.ne.s32.totalorder (!%p205_p0), %s910_s29, 0 }
  0x2e   : > { %208 = sbr.rel (%p205_p0) target bundleno = 756 (0x2f4), region = 40  ;;  %s533_s17 = sshll.u32 (!%p205_p0), %s842_s13, 3 }
  0x2f   : > { %s211_s23 = scalar_lea.sflag (!%p205_p0), [#allocation3], %s842_s13  ;;  %s214_s15 = scalar_lea.vmem (!%p205_p0), [#allocation2], %s533_s17 }
  0x33   : > { %686 = dma.done.wait (%p916_p6), %s211_s23, 128  }
  0x34   : > { %688 = vsyncadd (%p916_p6), %s211_s23, 4294967168  ;;  %vm245_vm0 = vcmask 1043456   ;;  %v241_v0 = vld [vmem:[%s214_s15] sm:$0xff]  ;;  %v710_v5 = vmov 0.0   ;;  %vm711_vm1 = vmmov 0   ;;  %v254_v7 = vlaneseq  ;;  %s546_s7 = sshll.u32 %s765_s22, 7 }
  0x35   : > { %v243_v1 = vcombine.high %v241_v0, %v241_v0  ;;  %v246_v2 = vsel %vm245_vm0, %v241_v0, 0.0  ;;  %551 = vmatprep.subr.mxu0 %v710_v5  ;;  %v251_v6 = vld [vmem:[%s902_s1] sm:$0xf]  ;;  %556 = vmatprep.subr.mxu1 %v710_v5  ;;  %vm260_vm2 = vcmask 31744   ;;  %vm343_vm3 = vcmask 1041408   ;;  %s240_s9 = scalar_lea.vmem [#allocation5], %s533_s17  ;;  %s454_s15 = scalar_lea.hbm %s906_s5, %s546_s7 }
  0x36   : > { %552 = vmatpush3.msk.msra.mxu0 %vm245_vm0, %v251_v6  ;;  %553 = vmatprep.mubr.msk.f32.mxu0 %vm711_vm1, %v710_v5  ;;  %v255_v8 = vand.u32 127, %v254_v7  ;;  %v257_v9 = vshrl.u32 %v254_v7, 7  ;;  %v337_v13 = vld [vmem:[%s904_s3] sm:$0x3]  ;;  %vm339_vm4 = vcmask 15360   ;;  %s456_s10 = sshll.u32 %s240_s9, 4  ;;  %s457_s10 = int_to_ptr.vmem [resolvable:$true] %s456_s10 }
  0x37   : > { %v247_v3 = vsel %vm245_vm0, %v243_v1, 0.0  ;;  %558 = vmatprep.mubr.msk.f32.mxu1 %vm711_vm1, %v710_v5  ;;  %557 = vmatpush3.msk.msra.mxu1 %vm343_vm3, %v337_v13  ;;  %v252_v14 = vld [vmem:[%s903_s2] sm:$0x1]  ;;  %v712_v29 = vmov 839922192   ;;  %s442_s12 = scalar_lea.sflag [#allocation4], %s842_s13 }
  0x38   : > { %v248_v4 = vadd.f32 %v247_v3, %v246_v2  ;;  %v258_v10 = vsub.s32 %v255_v8, %v257_v9  ;;  %v338_v19 = vld [vmem:[%s905_s4] sm:$0x1]  ;;  %v425_v26 = vsub.s32 0, %v257_v9  ;;  %v432_v30 = vunpack.c.l.s4 %v712_v29  ;;  %s643_s14 = scalar_lea.vmem %s457_s10, 128  ;;  %p917_p12 = scmp.ne.s32.totalorder %s911_s30, 0 }
  0x39   : > { %p644_p11 = scmp.ne.s32.totalorder %s457_s10, %s643_s14  ;;  %s713_s29 = smov [#allocation5]  }
  0x3a   : > { %249 = vadd.xlane.f32.xlu0 %v248_v4  ;;  %v433_v31 = vunpack.c.0.s8 %v432_v30  ;;  %s647_s16 = sshll.u32 %s713_s29, 4  ;;  %s648_s16 = int_to_ptr.vmem [resolvable:$false] %s647_s16 }
  0x3b   : > { %p645_p13 = pnand %p644_p11, %p917_p12  ;;  %s649_s22 = scalar_lea.vmem %s648_s16, 256 }
  0x3c   : > { %v436_v32 = vsub.s32 %v433_v31, %v257_v9  ;;  %p650_p3 = scmp.lt.s32.totalorder %s457_s10, %s648_s16  ;;  %p651_p5 = scmp.lt.s32.totalorder %s649_s22, %s643_s14 }
  0x3d   : > { %p646_p1 = pneg %p645_p13 }
  0x3e   : > { %p652_p8 = por %p651_p5, %p650_p3 }
  0x40   : > { %p653_p10 = pnand %p652_p8, %p646_p1 }
  0xc3   : > { %v250_v11 = vpop.xlane.xlu0 %249 }
  0xc4   : > { %v259_v12 = vrot.slane %v250_v11, %v258_v10 }
  0xc6   : > { %554 = vmatmul.mubr.msk.f32.vlgmr.msra.gmra.mxu0 %vm260_vm2, %v259_v12 }
 0x186   : > { %v332_v15 = vpop.f32.mrf.mxu0 }
 0x187   : > { %v333_v16 = vadd.f32 %v332_v15, %v252_v14 }
 0x188   : > { %v555_v17 = vpop.f32.mrf.mxu0 }
 0x189   : > { %v336_v18 = vmax.f32 %v333_v16, 0.0 }
 0x18b   : > { %559 = vmatmul.mubr.msk.f32.vlgmr.msra.gmra.mxu1 %vm339_vm4, %v336_v18 }
 0x24b   : > { %v413_v20 = vpop.f32.mrf.mxu1 }
 0x24c   : > { %v414_v21 = vadd.f32 %v413_v20, %v338_v19 }
 0x24d   : > { %v560_v22 = vpop.f32.mrf.mxu1 }
 0x24e   : > { %v539_v23 = vmul.f32 -1.442695, %v414_v21 }
 0x250   : > { %611 = vpow2.f32 %v539_v23 }
 0x25d   : > { %v612_v24 = vpop.eup %611 }
 0x25e   : > { %v420_v25 = vadd.f32 1.0, %v612_v24 }
 0x260   : > { %613 = vrcp.f32 %v420_v25 }
 0x26d   : > { %v614_v27 = vpop.eup %613 }
 0x26e   : > { %v426_v28 = vrot.slane %v614_v27, %v425_v26 }
 0x270   : > { %428 = vbcast.lane.b32.xlu0 %v426_v28, 256 }
 0x2e2   : > { %v429_v33 = vpop.permute.xlu0 %428 }
 0x2e3   : > { %v437_v34 = vrot.slane %v429_v33, %v436_v32 }
 0x2e5   : > { %v439_v35 = vmul.f32 %v437_v34, %v241_v0 }
 0x2e7   : > { %440 = vst [vmem:[%s240_s9] sm:$0xff] %v439_v35 }
 0x2e8   : > { %656 = shalt.err (!%p653_p10)
}
 0x2e9   : > { %s657_s17 = scalar_lea.hbm %s454_s15, 128  ;;  %s661_s26 = scalar_lea.hbm %s906_s5, 256 }
 0x2ea   : > { %p658_p2 = scmp.ne.s32.totalorder %s454_s15, %s657_s17  ;;  %p662_p7 = scmp.lt.s32.totalorder %s454_s15, %s906_s5 }
 0x2eb   : > { %p663_p0 = scmp.lt.s32.totalorder %s661_s26, %s657_s17 }
 0x2ec   : > { %p659_p4 = pnand %p658_p2, %p917_p12 }
 0x2ed   : > { %p664_p6 = por %p663_p0, %p662_p7 }
 0x2ee   : > { %p660_p9 = pneg %p659_p4 }
 0x2f0   : > { %p665_p11 = pnand %p664_p6, %p660_p9 }
 0x2f2   : > { %668 = shalt.err (!%p665_p11)
}
 0x2f3   : > { %563 = dma.vmem_to_hbm [thread:$0]  (%p917_p12), %s457_s10, 128, %s454_s15, %s442_s12  }
 0x2f4 PF: > { %s468_s7 = sand.u32 1, %s695_s18   ;;  %p918_p13 = scmp.ne.s32.totalorder %s912_s6, 0 }
 0x2f5   : > { %p919_p1 = scmp.ge.s32.totalorder %s707_s21, 2  ;;  %s469_s9 = scalar_lea.sflag [#allocation4], %s468_s7 }
 0x2f7   : > { %p570_p3 = pnand %p919_p1, %p918_p13 }
 0x2f9   : > { %p571_p5 = pneg %p570_p3 }
 0x2fb   : > { %690 = dma.done.wait (%p571_p5), %s469_s9, 128  }
 0x2fc   : > { %692 = vsyncadd (%p571_p5), %s469_s9, 4294967168  ;;  %p18_p8 = scmp.ge.s32.totalorder %s769_s24, 4   ;;  %s920_s18 = smov %s699_s19 }
 0x2fd   : > { %s921_s19 = smov %s703_s20  ;;  %s922_s20 = smov %s781_s27 }
 0x2fe   : > { %s923_s21 = smov %s769_s24  ;;  %20 = sbr.rel (!%p18_p8) target bundleno = 5 (0x5), region = 85 }
 0x303   :  { %474 = vsyncpa [#allocation3], 1 }
 0x304   :  { %476 = vsyncpa [#allocation3 + $0x1], 1 }
 0x305   :  { %477 = vsyncpa [#allocation4], 1 }
 0x306   :  { %479 = vsyncpa [#allocation4 + $0x1], 1 }

</bundles_post_ra>
